<compile_context>
chip_gen: v5e
topology: v5e:2x2
jax: 0.10.0
libtpu: 0.0.40
codegen_flags: <defaults>
</compile_context>

<pallas_src>
import functools

import jax
import jax.numpy as jnp
from jax.experimental import pallas as pl
from jax.experimental.pallas import tpu as pltpu


D_OUT_PAD = 8  # output lanes (d_out=3 zero-padded to 8); dense 32 B/row f32 writeback


# ----------------------------- Pallas kernel --------------------------------
def _render_mlp_kernel(x_ref, w0_ref, b0_ref, w1_ref, b1_ref, w2_ref, b2_ref,
                       o_ref):
    f32 = jnp.float32
    bf16 = jnp.bfloat16

    # ---- layer 0: single packed (tile_n, 48) @ (48, 64) dot + ReLU ----
    h = jnp.dot(x_ref[...], w0_ref[...], preferred_element_type=f32)
    h = jnp.maximum(h + b0_ref[...], 0.0)          # f32 bias/ReLU on VPU

    # ---- layer 1: Linear + ReLU ----
    h = jnp.dot(h.astype(bf16), w1_ref[...], preferred_element_type=f32)
    h = jnp.maximum(h + b1_ref[...], 0.0)

    # ---- layer 2: Linear (zero-padded to 8 lanes) + sigmoid ----
    y = jnp.dot(h.astype(bf16), w2_ref[...], preferred_element_type=f32)
    y = y + b2_ref[...]
    o_ref[...] = jax.nn.sigmoid(y).astype(o_ref.dtype)


# ------------------------------ tiling choice --------------------------------
def _round_up(x, m):
    return (x + m - 1) // m * m


def _pick_tile_n(n):
    """Row tile: target 8192 rows (amortizes the ~0.35us/step overhead to ~5%
    while keeping double-buffered VMEM far below the 32 MiB scoped default and
    v7x's 64 MiB), but never fewer than 4 grid steps when n allows it so both
    v7x TensorCores get balanced, pipelined work."""
    target = 8192
    if n <= 512:
        # tiny problems: aim for ~4 steps, keep rows a multiple of 16 (bf16 sublanes)
        return int(max(16, min(_round_up(pl.cdiv(n, 4), 16), _round_up(n, 16))))
    four_steps = _round_up(pl.cdiv(n, 4), 128)
    return int(min(target, four_steps))


# ------------------------------ pallas wrapper --------------------------------
@functools.partial(jax.jit, static_argnames=("d_out", "tile_n"))
def render_mlp_pallas(points, view_dirs, normals, feature_vectors, kparams,
                      *, d_out, tile_n=None):
    """Fused RenderNetwork forward (mode='idr', squeeze_out=True).

    points/view_dirs/normals: [N, 3]; feature_vectors: [N, d_feature].
    kparams: dict from prepare_kernel_params (bf16 weights with K/output
    padding, f32 biases). Returns [N, d_out] float32.
    """
    n = points.shape[0]
    d_feature = feature_vectors.shape[1]
    d_in_pad = kparams["w0"].shape[0]          # 9 + d_feature rounded up to 16
    d_h0 = kparams["w1"].shape[0]
    d_h1 = kparams["w1"].shape[1]
    d_real = 9 + d_feature
    pad_k = d_in_pad - d_real

    if tile_n is None:
        tile_n = _pick_tile_n(n)
    grid = (pl.cdiv(n, tile_n),)

    bf16 = jnp.bfloat16
    # Single fused concat + zero-pad + cast pass (mode='idr' concat order).
    streams = [points, view_dirs, normals, feature_vectors]
    if pad_k:
        streams.append(jnp.zeros((n, pad_k), points.dtype))
    x_packed = jnp.concatenate(streams, axis=-1).astype(bf16)   # (N, d_in_pad)

    row = lambda i: (i, 0)      # row-tiled packed input / output
    full = lambda i: (0, 0)     # weights / biases: same full block every step

    flops = 2 * n * (d_in_pad * d_h0 + d_h0 * d_h1 + d_h1 * D_OUT_PAD)
    bytes_accessed = (
        n * d_in_pad * 2                                           # bf16 input
        + (d_in_pad * d_h0 + d_h0 * d_h1 + d_h1 * D_OUT_PAD) * 2   # bf16 weights
        + (d_h0 + d_h1 + D_OUT_PAD) * 4                            # f32 biases
        + n * D_OUT_PAD * 4                                        # f32 output
    )
    cost = pl.CostEstimate(flops=flops,
                           transcendentals=n * D_OUT_PAD,
                           bytes_accessed=bytes_accessed)

    out_pad = pl.pallas_call(
        _render_mlp_kernel,
        out_shape=jax.ShapeDtypeStruct((n, D_OUT_PAD), jnp.float32),
        grid_spec=pltpu.PrefetchScalarGridSpec(
            num_scalar_prefetch=0,
            grid=grid,
            in_specs=[
                pl.BlockSpec((tile_n, d_in_pad), row),     # packed bf16 input
                pl.BlockSpec((d_in_pad, d_h0), full),      # W0 (padded K)
                pl.BlockSpec((1, d_h0), full),             # b0 (f32)
                pl.BlockSpec((d_h0, d_h1), full),          # W1
                pl.BlockSpec((1, d_h1), full),             # b1 (f32)
                pl.BlockSpec((d_h1, D_OUT_PAD), full),     # W2 (padded out)
                pl.BlockSpec((1, D_OUT_PAD), full),        # b2 (padded, f32)
            ],
            out_specs=pl.BlockSpec((tile_n, D_OUT_PAD), row),
        ),
        compiler_params=pltpu.CompilerParams(
            dimension_semantics=("parallel",),
        ),
        cost_estimate=cost,
    )(x_packed,
      kparams["w0"], kparams["b0"],
      kparams["w1"], kparams["b1"],
      kparams["w2"], kparams["b2"])

    # Slice the tiny (N, 8) buffer down to the real output width.
    return out_pad[:, :d_out]


# ------------------------- parameter construction ---------------------------
def make_weight_norm_linear(key, d_in, d_out):
    """Deterministic init of a weight-normalized Linear layer.

    PyTorch: weight [out, in], weight_norm(dim=0) -> w = g * v / ||v||_row.
    Returns the effective W transposed to [in, out] plus bias [1, out] (f32).
    """
    kv, kg, kb = jax.random.split(key, 3)
    v = jax.random.normal(kv, (d_out, d_in), dtype=jnp.float32) * 0.1
    g = jax.random.uniform(kg, (d_out, 1), dtype=jnp.float32, minval=0.5, maxval=1.5)
    b = jax.random.normal(kb, (d_out,), dtype=jnp.float32) * 0.01
    norm = jnp.sqrt(jnp.sum(v * v, axis=1, keepdims=True))
    w_eff = g * v / norm                        # [out, in]
    return w_eff.T, b.reshape(1, d_out)         # [in, out], [1, out]


def prepare_kernel_params(params_f32):
    """Zero-pad W0 rows (K: 41 -> 48) and the output layer (3 -> 8 lanes),
    cast weights to bf16 (biases stay f32)."""
    (w0, b0), (w1, b1), (w2, b2) = params_f32

    d_real, d_h0 = w0.shape
    d_in_pad = _round_up(d_real, 16)            # bf16 sublane-friendly K
    w0_pad = jnp.zeros((d_in_pad, d_h0), jnp.float32).at[:d_real, :].set(w0)

    d_h1, d_out = w2.shape
    w2_pad = jnp.zeros((d_h1, D_OUT_PAD), jnp.float32).at[:, :d_out].set(w2)
    b2_pad = jnp.zeros((1, D_OUT_PAD), jnp.float32).at[:, :d_out].set(b2)

    bf16 = jnp.bfloat16
    return dict(
        w0=w0_pad.astype(bf16), b0=b0.astype(jnp.float32),
        w1=w1.astype(bf16), b1=b1.astype(jnp.float32),
        w2=w2_pad.astype(bf16), b2=b2_pad.astype(jnp.float32),
    )


def reference_forward_bf16(points, view_dirs, normals, feats, params_f32):
    """Pure-JAX reference matching the kernel's numerics:
    bf16 matmul operands, f32 accumulation, f32 bias/ReLU/sigmoid."""
    x = jnp.concatenate([points, view_dirs, normals, feats], axis=-1)
    h = x
    n_lin = len(params_f32)
    for l, (w, b) in enumerate(params_f32):
        h = jnp.dot(h.astype(jnp.bfloat16), w.astype(jnp.bfloat16),
                    preferred_element_type=jnp.float32) + b
        if l < n_lin - 1:
            h = jnp.maximum(h, 0.0)
    return jax.nn.sigmoid(h)


# ----------------------------------- main ------------------------------------
if __name__ == "__main__":
    # RenderNetwork config: mode='idr', d_in=9 (points 3 + view_dirs 3 +
    # normals 3), d_feature=32, d_hidden=64, n_layers=2, d_out=3,
    # weight_norm=True, multires_*=0, squeeze_out=True.
    d_feature, d_in, d_out, d_hidden, n_layers = 32, 9, 3, 64, 2
    dims = [d_in + d_feature] + [d_hidden] * n_layers + [d_out]   # [41, 64, 64, 3]

    N = 256  # number of points/rays (small test size)

    key = jax.random.PRNGKey(0)
    k_pts, k_nrm, k_dir, k_feat, k_p0, k_p1, k_p2 = jax.random.split(key, 7)

    points = jax.random.normal(k_pts, (N, 3), dtype=jnp.float32)
    normals = jax.random.normal(k_nrm, (N, 3), dtype=jnp.float32)
    view_dirs = jax.random.normal(k_dir, (N, 3), dtype=jnp.float32)
    feature_vectors = jax.random.normal(k_feat, (N, d_feature), dtype=jnp.float32)

    params_f32 = [
        make_weight_norm_linear(k_p0, dims[0], dims[1]),
        make_weight_norm_linear(k_p1, dims[1], dims[2]),
        make_weight_norm_linear(k_p2, dims[2], dims[3]),
    ]
    kparams = prepare_kernel_params(params_f32)

    out = render_mlp_pallas(points, view_dirs, normals, feature_vectors,
                            kparams, d_out=d_out)
    out = jax.block_until_ready(out)

    ref = reference_forward_bf16(points, view_dirs, normals,
                                 feature_vectors, params_f32)
    assert out.shape == (N, d_out), out.shape
    assert jnp.allclose(out, ref, atol=5e-3, rtol=5e-3), (
        float(jnp.max(jnp.abs(out - ref)))
    )

    print("KERNEL_OK")
</pallas_src>

<mosaic_0001>
module attributes {stable_mosaic.version = 11 : i64} {
  func.func @_render_mlp_kernel(%arg0: i32, %arg1: memref<64x48xbf16, #tpu.memory_space<vmem>>, %arg2: memref<48x64xbf16, #tpu.memory_space<vmem>>, %arg3: memref<1x64xf32, #tpu.memory_space<vmem>>, %arg4: memref<64x64xbf16, #tpu.memory_space<vmem>>, %arg5: memref<1x64xf32, #tpu.memory_space<vmem>>, %arg6: memref<64x8xbf16, #tpu.memory_space<vmem>>, %arg7: memref<1x8xf32, #tpu.memory_space<vmem>>, %arg8: memref<64x8xf32, #tpu.memory_space<vmem>>) attributes {dimension_semantics = [#tpu.dimension_semantics<parallel>], iteration_bounds = array<i64: 4>, scalar_prefetch = 0 : i64, scratch_operands = 0 : i64, tpu.core_type = #tpu.core_type<tc>, window_params = [{transform_indices = @transform_0, window_bounds = array<i64: 64, 48>}, {pipeline_mode = #tpu.pipeline_mode<synchronous>, transform_indices = @transform_1, window_bounds = array<i64: 48, 64>}, {pipeline_mode = #tpu.pipeline_mode<synchronous>, transform_indices = @transform_2, window_bounds = array<i64: 1, 64>}, {pipeline_mode = #tpu.pipeline_mode<synchronous>, transform_indices = @transform_3, window_bounds = array<i64: 64, 64>}, {pipeline_mode = #tpu.pipeline_mode<synchronous>, transform_indices = @transform_4, window_bounds = array<i64: 1, 64>}, {pipeline_mode = #tpu.pipeline_mode<synchronous>, transform_indices = @transform_5, window_bounds = array<i64: 64, 8>}, {pipeline_mode = #tpu.pipeline_mode<synchronous>, transform_indices = @transform_6, window_bounds = array<i64: 1, 8>}, {transform_indices = @transform_7, window_bounds = array<i64: 64, 8>}]} {
    %c0 = arith.constant 0 : index
    %c0_0 = arith.constant 0 : index
    %0 = vector.load %arg1[%c0, %c0_0] : memref<64x48xbf16, #tpu.memory_space<vmem>>, vector<64x48xbf16>
    %c0_1 = arith.constant 0 : index
    %c0_2 = arith.constant 0 : index
    %1 = vector.load %arg2[%c0_1, %c0_2] : memref<48x64xbf16, #tpu.memory_space<vmem>>, vector<48x64xbf16>
    %cst = arith.constant dense<0.000000e+00> : vector<64x64xf32>
    %2 = tpu.matmul %0, %1, %cst {dimension_numbers = #tpu.dot_dimension_numbers<[1], [0], [0], [1], [0, 0, 1, 1], [], []>} : vector<64x48xbf16>, vector<48x64xbf16>, vector<64x64xf32> -> vector<64x64xf32>
    %c0_3 = arith.constant 0 : index
    %c0_4 = arith.constant 0 : index
    %3 = vector.load %arg3[%c0_3, %c0_4] : memref<1x64xf32, #tpu.memory_space<vmem>>, vector<1x64xf32>
    %4 = vector.broadcast %3 : vector<1x64xf32> to vector<64x64xf32>
    %5 = arith.addf %2, %4 : vector<64x64xf32>
    %cst_5 = arith.constant 0.000000e+00 : f32
    %6 = vector.broadcast %cst_5 : f32 to vector<64x64xf32>
    %7 = arith.maximumf %5, %6 : vector<64x64xf32>
    %8 = arith.truncf %7 : vector<64x64xf32> to vector<64x64xbf16>
    %c0_6 = arith.constant 0 : index
    %c0_7 = arith.constant 0 : index
    %9 = vector.load %arg4[%c0_6, %c0_7] : memref<64x64xbf16, #tpu.memory_space<vmem>>, vector<64x64xbf16>
    %cst_8 = arith.constant dense<0.000000e+00> : vector<64x64xf32>
    %10 = tpu.matmul %8, %9, %cst_8 {dimension_numbers = #tpu.dot_dimension_numbers<[1], [0], [0], [1], [0, 0, 1, 1], [], []>} : vector<64x64xbf16>, vector<64x64xbf16>, vector<64x64xf32> -> vector<64x64xf32>
    %c0_9 = arith.constant 0 : index
    %c0_10 = arith.constant 0 : index
    %11 = vector.load %arg5[%c0_9, %c0_10] : memref<1x64xf32, #tpu.memory_space<vmem>>, vector<1x64xf32>
    %12 = vector.broadcast %11 : vector<1x64xf32> to vector<64x64xf32>
    %13 = arith.addf %10, %12 : vector<64x64xf32>
    %cst_11 = arith.constant 0.000000e+00 : f32
    %14 = vector.broadcast %cst_11 : f32 to vector<64x64xf32>
    %15 = arith.maximumf %13, %14 : vector<64x64xf32>
    %16 = arith.truncf %15 : vector<64x64xf32> to vector<64x64xbf16>
    %c0_12 = arith.constant 0 : index
    %c0_13 = arith.constant 0 : index
    %17 = vector.load %arg6[%c0_12, %c0_13] : memref<64x8xbf16, #tpu.memory_space<vmem>>, vector<64x8xbf16>
    %cst_14 = arith.constant dense<0.000000e+00> : vector<64x8xf32>
    %18 = tpu.matmul %16, %17, %cst_14 {dimension_numbers = #tpu.dot_dimension_numbers<[1], [0], [0], [1], [0, 0, 1, 1], [], []>} : vector<64x64xbf16>, vector<64x8xbf16>, vector<64x8xf32> -> vector<64x8xf32>
    %c0_15 = arith.constant 0 : index
    %c0_16 = arith.constant 0 : index
    %19 = vector.load %arg7[%c0_15, %c0_16] : memref<1x8xf32, #tpu.memory_space<vmem>>, vector<1x8xf32>
    %20 = vector.broadcast %19 : vector<1x8xf32> to vector<64x8xf32>
    %21 = arith.addf %18, %20 : vector<64x8xf32>
    %22 = arith.negf %21 : vector<64x8xf32>
    %23 = math.exp %22 : vector<64x8xf32>
    %cst_17 = arith.constant 1.000000e+00 : f32
    %24 = vector.broadcast %cst_17 : f32 to vector<64x8xf32>
    %25 = arith.addf %24, %23 : vector<64x8xf32>
    %26 = arith.divf %24, %25 : vector<64x8xf32>
    %c0_18 = arith.constant 0 : index
    %c0_19 = arith.constant 0 : index
    %27 = vector.load %arg8[%c0_18, %c0_19] : memref<64x8xf32, #tpu.memory_space<vmem>>, vector<64x8xf32>
    tpu.vector_store %arg8[%c0_18, %c0_19], %26 {strides = array<i32>} : memref<64x8xf32, #tpu.memory_space<vmem>>, vector<64x8xf32>,
    return
  }
  func.func @transform_0(%arg0: i32) -> (i32, i32) {
    %c0_i32 = arith.constant 0 : i32
    %c0_i32_0 = arith.constant 0 : i32
    return %arg0, %c0_i32 : i32, i32
  }
  func.func @transform_1(%arg0: i32) -> (i32, i32) {
    %c0_i32 = arith.constant 0 : i32
    %c0_i32_0 = arith.constant 0 : i32
    %c0_i32_1 = arith.constant 0 : i32
    return %c0_i32, %c0_i32_0 : i32, i32
  }
  func.func @transform_2(%arg0: i32) -> (i32, i32) {
    %c0_i32 = arith.constant 0 : i32
    %c0_i32_0 = arith.constant 0 : i32
    %c0_i32_1 = arith.constant 0 : i32
    return %c0_i32, %c0_i32_0 : i32, i32
  }
  func.func @transform_3(%arg0: i32) -> (i32, i32) {
    %c0_i32 = arith.constant 0 : i32
    %c0_i32_0 = arith.constant 0 : i32
    %c0_i32_1 = arith.constant 0 : i32
    return %c0_i32, %c0_i32_0 : i32, i32
  }
  func.func @transform_4(%arg0: i32) -> (i32, i32) {
    %c0_i32 = arith.constant 0 : i32
    %c0_i32_0 = arith.constant 0 : i32
    %c0_i32_1 = arith.constant 0 : i32
    return %c0_i32, %c0_i32_0 : i32, i32
  }
  func.func @transform_5(%arg0: i32) -> (i32, i32) {
    %c0_i32 = arith.constant 0 : i32
    %c0_i32_0 = arith.constant 0 : i32
    %c0_i32_1 = arith.constant 0 : i32
    return %c0_i32, %c0_i32_0 : i32, i32
  }
  func.func @transform_6(%arg0: i32) -> (i32, i32) {
    %c0_i32 = arith.constant 0 : i32
    %c0_i32_0 = arith.constant 0 : i32
    %c0_i32_1 = arith.constant 0 : i32
    return %c0_i32, %c0_i32_0 : i32, i32
  }
  func.func @transform_7(%arg0: i32) -> (i32, i32) {
    %c0_i32 = arith.constant 0 : i32
    %c0_i32_0 = arith.constant 0 : i32
    return %arg0, %c0_i32 : i32, i32
  }
}

</mosaic_0001>

<bundles_post_ra>
// kernel: render_mlp_pallas.1
= control target key start
LH: loop header
LB: loop body
LE: loop exit
PB: predicated region body
PF: predicated region fallthrough
CT: control target
= control target key end

     0   :  { %s982_s24 = smov 0   ;;  %s1081_s0 = inlined_call_operand.vmem [shape: bf16[256,48], index: 0, kind: input, shape index: {}]   ;;  %s1082_s1 = inlined_call_operand.vmem [shape: bf16[48,64], index: 1, kind: input, shape index: {}]   ;;  %s1083_s2 = inlined_call_operand.vmem [shape: f32[1,64], index: 2, kind: input, shape index: {}]   ;;  %s1084_s3 = inlined_call_operand.vmem [shape: bf16[64,64], index: 3, kind: input, shape index: {}]   ;;  %s1085_s4 = inlined_call_operand.vmem [shape: f32[1,64], index: 4, kind: input, shape index: {}]   ;;  %s1086_s5 = inlined_call_operand.vmem [shape: bf16[64,8], index: 5, kind: input, shape index: {}]   ;;  %s1087_s6 = inlined_call_operand.vmem [shape: f32[1,8], index: 6, kind: input, shape index: {}]   ;;  %s1088_s7 = inlined_call_operand.vmem [shape: f32[256,8], index: 7, kind: output, shape index: {}]  }
   0x1 LB: > { %s777_s25 = sadd.s32 4294967295, %s940_s24   ;;  %p781_p0 = scmp.ge.s32.totalorder %s940_s24, 1  ;;  %s940_s24 = sphi %s982_s24, %s17_s24  }
   0x2   : > { %p238_p1 = scmp.lt.s32.totalorder %s940_s24, 5 }
   0x4   : > { %p239_p2 = pnand %p781_p0, %p238_p1 }
   0x5   : > { %s782_s28 = sshll.u32 (!%p239_p2), %s777_s25, 3 }
   0x6   : > { %242 = sbr.rel (%p239_p2) target bundleno = 528 (0x210), region = 48  ;;  %p271_p3 = scmp.lt.s32.totalorder (!%p239_p2), %s782_s28, 31 }
   0xb   : > { %v874_v0 = vld [vmem:[%s1082_s1 + $0x10] sm:$0xff]  ;;  %v873_v1 = vld [vmem:[%s1082_s1 + $0x8] sm:$0xff]  ;;  %s1090_s28 = smov (!%p271_p3, %s782_s28), 31  ;;  %v872_v2 = vld [vmem:[%s1082_s1] sm:$0xff]  ;;  %vm339_vm0 = vcmask 392192   ;;  %vm429_vm1 = vcmask 523264  }
   0xc   : > { %357 = vmatpush.bf16.msra.mxu0 %v874_v0  ;;  %s783_s8 = sshll.u32 %s1090_s28, 2  ;;  %v878_v7 = vld [vmem:[%s1084_s3 + $0x18] sm:$0xff]  ;;  %v877_v8 = vld [vmem:[%s1084_s3 + $0x10] sm:$0xff]  ;;  %v876_v9 = vld [vmem:[%s1084_s3 + $0x8] sm:$0xff]  ;;  %s785_s15 = sshll.u32 %s1090_s28, 3  ;;  %vm712_vm5 = vcmask 64512  }
   0xd   : > { %s274_s13 = scalar_lea.vmem %s1081_s0, %s783_s8  ;;  %446 = vmatpush.bf16.msra.mxu1 %v878_v7  ;;  %883 = vmatpush.bf16.msra.mxu3 %v878_v7  ;;  %v875_v10 = vld [vmem:[%s1084_s3] sm:$0xff]  ;;  %v882_v40 = vld [vmem:[%s1086_s5 + $0x18] sm:$0xff]  ;;  %v881_v41 = vld [vmem:[%s1086_s5 + $0x10] sm:$0xff]  ;;  %s1054_s18 = scalar_lea.vmem %s1088_s7, %s785_s15 }
   0xe   : > { %v868_v3 = vld [vmem:[%s274_s13] sm:$0xff]  ;;  %v869_v4 = vld [vmem:[%s274_s13 + $0x8] sm:$0xff]  ;;  %v870_v5 = vld [vmem:[%s274_s13 + $0x10] sm:$0xff]  ;;  %887 = vmatpush.bf16.msra.mxu2 %v882_v40 }
   0xf   : > { %v871_v6 = vld [vmem:[%s274_s13 + $0x18] sm:$0xff]  ;;  %v899_v12 = vld [vmem:[%s1083_s2] ss:$0 sm:$0xff]  ;;  %v880_v42 = vld [vmem:[%s1086_s5 + $0x8] sm:$0xff] }
  0x10   : > { %358 = vmatpush.bf16.msra.mxu0 %v873_v1  ;;  %v879_v43 = vld [vmem:[%s1086_s5] sm:$0xff] }
  0x11   : > { %447 = vmatpush.bf16.msra.mxu1 %v877_v8  ;;  %884 = vmatpush.bf16.msra.mxu3 %v877_v8  ;;  %v900_v45 = vld [vmem:[%s1085_s4] ss:$0 sm:$0xff] }
  0x12   : > { %888 = vmatpush.bf16.msra.mxu2 %v881_v41 }
  0x14   : > { %359 = vmatpush.bf16.msra.mxu0 %v872_v2 }
  0x15   : > { %448 = vmatpush.bf16.msra.mxu1 %v876_v9  ;;  %885 = vmatpush.bf16.msra.mxu3 %v876_v9  ;;  %v1046_v9 = vld [vmem:[%s1087_s6] ss:$0 sm:$0xff] }
  0x16   : > { %889 = vmatpush.bf16.msra.mxu2 %v880_v42 }
  0x17   : > { %814 = vmatmul.msk.bf16.vlgmr.msra.gmra.mxu0 %vm339_vm0, %v868_v3 }
  0x19   : > { %449 = vmatpush.bf16.msra.mxu1 %v875_v10  ;;  %886 = vmatpush.bf16.msra.mxu3 %v875_v10 }
  0x1a   : > { %890 = vmatpush.bf16.msra.mxu2 %v879_v43 }
  0x1d   : > { %535 = vmatpush.bf16.msrb.mxu1 %v882_v40 }
  0x21   : > { %536 = vmatpush.bf16.msrb.mxu1 %v881_v41 }
  0x25   : > { %537 = vmatpush.bf16.msrb.mxu1 %v880_v42 }
  0x27   : > { %815 = vmatmul.msk.bf16.gmra.mxu0 %vm339_vm0, %v869_v4 }
  0x29   : > { %538 = vmatpush.bf16.msrb.mxu1 %v879_v43 }
  0x37   : > { %816 = vmatmul.msk.bf16.gmra.mxu0 %vm339_vm0, %v870_v5 }
  0x47   : > { %817 = vmatmul.msk.bf16.gmra.mxu0 %vm339_vm0, %v871_v6 }
  0x94   : > { %v361_v11 = vpop.f32.mrf.mxu0 }
  0x95   : > { %v362_v13 = vadd.f32 %v899_v12, %v361_v11 }
  0x97   : > { %v381_v16 = vmax.f32 %v362_v13, 0.0 }
  0x9c   : > { %v363_v14 = vpop.f32.mrf.mxu0 }
  0x9d   : > { %v364_v15 = vadd.f32 %v899_v12, %v363_v14 }
  0x9f   : > { %v382_v17 = vmax.f32 %v364_v15, 0.0 }
  0xa1   : > { %v389_v18 = vpack.c.bf16 %v382_v17, %v381_v16 }
  0xa3   : > { %834 = vmatmul.msk.bf16.vlgmr.msra.gmra.mxu1 %vm429_vm1, %v389_v18 }
  0xa4   : > { %v366_v19 = vpop.f32.mrf.mxu0 }
  0xa5   : > { %v367_v20 = vadd.f32 %v899_v12, %v366_v19 }
  0xa7   : > { %v383_v23 = vmax.f32 %v367_v20, 0.0 }
  0xac   : > { %v368_v21 = vpop.f32.mrf.mxu0 }
  0xad   : > { %v369_v22 = vadd.f32 %v899_v12, %v368_v21 }
  0xaf   : > { %v384_v24 = vmax.f32 %v369_v22, 0.0 }
  0xb1   : > { %v390_v25 = vpack.c.bf16 %v384_v24, %v383_v23 }
  0xb3   : > { %835 = vmatmul.msk.bf16.vlgmr.msra.gmra.mxu3 %vm429_vm1, %v390_v25 }
  0xb4   : > { %v371_v26 = vpop.f32.mrf.mxu0 }
  0xb5   : > { %v372_v27 = vadd.f32 %v899_v12, %v371_v26 }
  0xb7   : > { %v385_v30 = vmax.f32 %v372_v27, 0.0 }
  0xbc   : > { %v373_v28 = vpop.f32.mrf.mxu0 }
  0xbd   : > { %v374_v29 = vadd.f32 %v899_v12, %v373_v28 }
  0xbf   : > { %v386_v31 = vmax.f32 %v374_v29, 0.0 }
  0xc1   : > { %v391_v32 = vpack.c.bf16 %v386_v31, %v385_v30 }
  0xc3   : > { %836 = vmatmul.msk.bf16.gmra.mxu3 %vm429_vm1, %v391_v32 }
  0xc4   : > { %v376_v33 = vpop.f32.mrf.mxu0 }
  0xc5   : > { %v377_v34 = vadd.f32 %v899_v12, %v376_v33 }
  0xc7   : > { %v387_v37 = vmax.f32 %v377_v34, 0.0 }
  0xcc   : > { %v378_v35 = vpop.f32.mrf.mxu0 }
  0xcd   : > { %v379_v36 = vadd.f32 %v899_v12, %v378_v35 }
  0xcf   : > { %v388_v38 = vmax.f32 %v379_v36, 0.0 }
  0xd1   : > { %v392_v39 = vpack.c.bf16 %v388_v38, %v387_v37 }
  0xd3   : > { %837 = vmatmul.msk.bf16.gmra.mxu3 %vm429_vm1, %v392_v39 }
 0x120   : > { %v451_v44 = vpop.f32.mrf.mxu1 }
 0x121   : > { %v452_v46 = vadd.f32 %v900_v45, %v451_v44 }
 0x123   : > { %v471_v49 = vmax.f32 %v452_v46, 0.0 }
 0x128   : > { %v453_v47 = vpop.f32.mrf.mxu1 }
 0x129   : > { %v454_v48 = vadd.f32 %v900_v45, %v453_v47 }
 0x12b   : > { %v472_v50 = vmax.f32 %v454_v48, 0.0 }
 0x12d   : > { %v479_v51 = vpack.c.bf16 %v472_v50, %v471_v49 }
 0x12f   : > { %854 = vmatmul.msk.bf16.vlgmr.msrb.gmra.mxu1 %vm429_vm1, %v479_v51 }
 0x136   : > { %v456_v52 = vpop.f32.mrf.mxu3 }
 0x137   : > { %v457_v53 = vadd.f32 %v900_v45, %v456_v52 }
 0x139   : > { %v473_v56 = vmax.f32 %v457_v53, 0.0 }
 0x13e   : > { %v458_v54 = vpop.f32.mrf.mxu3 }
 0x13f   : > { %v459_v55 = vadd.f32 %v900_v45, %v458_v54 }
 0x141   : > { %v474_v57 = vmax.f32 %v459_v55, 0.0 }
 0x143   : > { %v480_v58 = vpack.c.bf16 %v474_v57, %v473_v56 }
 0x145   : > { %855 = vmatmul.msk.bf16.vlgmr.msra.gmra.mxu2 %vm429_vm1, %v480_v58 }
 0x146   : > { %v461_v59 = vpop.f32.mrf.mxu3 }
 0x147   : > { %v462_v60 = vadd.f32 %v900_v45, %v461_v59 }
 0x149   : > { %v475_v63 = vmax.f32 %v462_v60, 0.0 }
 0x14e   : > { %v463_v61 = vpop.f32.mrf.mxu3 }
 0x14f   : > { %v464_v62 = vadd.f32 %v900_v45, %v463_v61 }
 0x151   : > { %v476_v0 = vmax.f32 %v464_v62, 0.0 }
 0x153   : > { %v481_v1 = vpack.c.bf16 %v476_v0, %v475_v63 }
 0x155   : > { %856 = vmatmul.msk.bf16.gmra.mxu2 %vm429_vm1, %v481_v1 }
 0x156   : > { %v466_v2 = vpop.f32.mrf.mxu3 }
 0x157   : > { %v467_v3 = vadd.f32 %v900_v45, %v466_v2 }
 0x159   : > { %v477_v6 = vmax.f32 %v467_v3, 0.0 }
 0x15e   : > { %v468_v4 = vpop.f32.mrf.mxu3 }
 0x15f   : > { %v469_v5 = vadd.f32 %v900_v45, %v468_v4 }
 0x161   : > { %v478_v7 = vmax.f32 %v469_v5, 0.0 }
 0x163   : > { %v482_v8 = vpack.c.bf16 %v478_v7, %v477_v6 }
 0x165   : > { %857 = vmatmul.msk.bf16.gmra.mxu2 %vm429_vm1, %v482_v8 }
 0x1ac   : > { %v540_v10 = vpop.f32.mrf.mxu1 }
 0x1ad   : > { %v541_v11 = vadd.f32 %v1046_v9, %v540_v10 }
 0x1af   : > { %v858_v12 = vmul.f32 -1.442695, %v541_v11 }
 0x1b1   : > { %902 = vpow2.f32 %v858_v12 }
 0x1b4   : > { %v542_v13 = vpop.f32.mrf.mxu1 }
 0x1b5   : > { %v543_v14 = vadd.f32 %v1046_v9, %v542_v13 }
 0x1b7   : > { %v903_v15 = vpop.eup %902  ;;  %v859_v16 = vmul.f32 -1.442695, %v543_v14 }
 0x1b8   : > { %v584_v17 = vadd.f32 1.0, %v903_v15 }
 0x1b9   : > { %904 = vpow2.f32 %v859_v16 }
 0x1ba   : > { %906 = vrcp.f32 %v584_v17  ;;  %v603_v23 = vand.u32 2147483648, %v584_v17  ;;  %v601_v25 = vand.u32 2147483647, %v584_v17  ;;  %vm597_vm3 = vweird.f32 %v584_v17 }
 0x1bc   : > { %v604_v28 = vor.u32 1.1754944e-38, %v603_v23  ;;  %vm602_vm6 = vcmp.eq.f32.partialorder %v601_v25, 8.507059e+37 }
 0x1bf   : > { %v905_v18 = vpop.eup %904 }
 0x1c0   : > { %v907_v19 = vpop.eup %906  ;;  %v585_v20 = vadd.f32 1.0, %v905_v18 }
 0x1c1   : > { %v593_v21 = vmul.f32 %v907_v19, %v584_v17  ;;  %vm598_vm2 = vweird.f32 %v907_v19 }
 0x1c2   : > { %908 = vrcp.f32 %v585_v20  ;;  %vm599_vm4 = vmor %vm597_vm3, %vm598_vm2  ;;  %v618_v36 = vand.u32 2147483648, %v585_v20  ;;  %v616_v38 = vand.u32 2147483647, %v585_v20  ;;  %vm612_vm8 = vweird.f32 %v585_v20 }
 0x1c3   : > { %v594_v22 = vsub.f32 1.0, %v593_v21 }
 0x1c4   : > { %v619_v40 = vor.u32 1.1754944e-38, %v618_v36  ;;  %vm617_vm10 = vcmp.eq.f32.partialorder %v616_v38, 8.507059e+37 }
 0x1c5   : > { %v595_v24 = vmul.f32 %v907_v19, %v594_v22 }
 0x1c7   : > { %v596_v26 = vadd.f32 %v907_v19, %v595_v24 }
 0x1c8   : > { %v909_v27 = vpop.eup %908  ;;  %v545_v29 = vpop.f32.mrf.mxu2 }
 0x1c9   : > { %v600_v30 = vsel %vm599_vm4, %v907_v19, %v596_v26  ;;  %v608_v31 = vmul.f32 %v909_v27, %v585_v20  ;;  %v546_v32 = vadd.f32 %v1046_v9, %v545_v29  ;;  %vm613_vm7 = vweird.f32 %v909_v27 }
 0x1ca   : > { %v605_v33 = vsel %vm602_vm6, %v604_v28, %v600_v30  ;;  %vm614_vm9 = vmor %vm612_vm8, %vm613_vm7 }
 0x1cb   : > { %713 = vst.msk [vmem:[%s1054_s18] sm:$0xff] %vm712_vm5, %v605_v33  ;;  %v609_v34 = vsub.f32 1.0, %v608_v31  ;;  %v860_v35 = vmul.f32 -1.442695, %v546_v32 }
 0x1cd   : > { %v610_v37 = vmul.f32 %v909_v27, %v609_v34  ;;  %910 = vpow2.f32 %v860_v35 }
 0x1cf   : > { %v611_v39 = vadd.f32 %v909_v27, %v610_v37 }
 0x1d0   : > { %v547_v41 = vpop.f32.mrf.mxu2 }
 0x1d1   : > { %v615_v42 = vsel %vm614_vm9, %v909_v27, %v611_v39  ;;  %v548_v43 = vadd.f32 %v1046_v9, %v547_v41 }
 0x1d2   : > { %v620_v44 = vsel %vm617_vm10, %v619_v40, %v615_v42 }
 0x1d3   : > { %v911_v45 = vpop.eup %910  ;;  %714 = vst.msk [vmem:[%s1054_s18 + $0x8] sm:$0xff] %vm712_vm5, %v620_v44  ;;  %v861_v46 = vmul.f32 -1.442695, %v548_v43 }
 0x1d4   : > { %v586_v47 = vadd.f32 1.0, %v911_v45 }
 0x1d5   : > { %912 = vpow2.f32 %v861_v46 }
 0x1d6   : > { %914 = vrcp.f32 %v586_v47  ;;  %v633_v56 = vand.u32 2147483648, %v586_v47  ;;  %v631_v59 = vand.u32 2147483647, %v586_v47  ;;  %vm627_vm12 = vweird.f32 %v586_v47 }
 0x1d8   : > { %v550_v48 = vpop.f32.mrf.mxu2  ;;  %v634_v1 = vor.u32 1.1754944e-38, %v633_v56  ;;  %vm632_vm14 = vcmp.eq.f32.partialorder %v631_v59, 8.507059e+37 }
 0x1d9   : > { %v551_v49 = vadd.f32 %v1046_v9, %v550_v48 }
 0x1db   : > { %v913_v50 = vpop.eup %912  ;;  %v862_v51 = vmul.f32 -1.442695, %v551_v49 }
 0x1dc   : > { %v915_v52 = vpop.eup %914  ;;  %v587_v53 = vadd.f32 1.0, %v913_v50 }
 0x1dd   : > { %v623_v54 = vmul.f32 %v915_v52, %v586_v47  ;;  %916 = vpow2.f32 %v862_v51  ;;  %vm628_vm11 = vweird.f32 %v915_v52 }
 0x1de   : > { %918 = vrcp.f32 %v587_v53  ;;  %vm629_vm13 = vmor %vm627_vm12, %vm628_vm11  ;;  %v648_v7 = vand.u32 2147483648, %v587_v53  ;;  %v646_v11 = vand.u32 2147483647, %v587_v53  ;;  %vm642_vm0 = vweird.f32 %v587_v53 }
 0x1df   : > { %v624_v55 = vsub.f32 1.0, %v623_v54 }
 0x1e0   : > { %v552_v57 = vpop.f32.mrf.mxu2  ;;  %v649_v17 = vor.u32 1.1754944e-38, %v648_v7  ;;  %vm647_vm2 = vcmp.eq.f32.partialorder %v646_v11, 8.507059e+37 }
 0x1e1   : > { %v625_v58 = vmul.f32 %v915_v52, %v624_v55  ;;  %v553_v60 = vadd.f32 %v1046_v9, %v552_v57 }
 0x1e3   : > { %v917_v61 = vpop.eup %916  ;;  %v626_v62 = vadd.f32 %v915_v52, %v625_v58  ;;  %v863_v63 = vmul.f32 -1.442695, %v553_v60 }
 0x1e4   : > { %v919_v0 = vpop.eup %918  ;;  %v588_v2 = vadd.f32 1.0, %v917_v61 }
 0x1e5   : > { %v630_v3 = vsel %vm629_vm13, %v915_v52, %v626_v62  ;;  %v638_v4 = vmul.f32 %v919_v0, %v587_v53  ;;  %920 = vpow2.f32 %v863_v63  ;;  %vm643_vm15 = vweird.f32 %v919_v0 }
 0x1e6   : > { %v635_v5 = vsel %vm632_vm14, %v634_v1, %v630_v3  ;;  %922 = vrcp.f32 %v588_v2  ;;  %vm644_vm1 = vmor %vm642_vm0, %vm643_vm15  ;;  %v663_v23 = vand.u32 2147483648, %v588_v2  ;;  %v661_v26 = vand.u32 2147483647, %v588_v2 }
 0x1e7   : > { %715 = vst.msk [vmem:[%s1054_s18 + $0x10] sm:$0xff] %vm712_vm5, %v635_v5  ;;  %v639_v6 = vsub.f32 1.0, %v638_v4  ;;  %vm657_vm4 = vweird.f32 %v588_v2 }
 0x1e8   : > { %v555_v8 = vpop.f32.mrf.mxu2  ;;  %v664_v32 = vor.u32 1.1754944e-38, %v663_v23  ;;  %vm662_vm7 = vcmp.eq.f32.partialorder %v661_v26, 8.507059e+37 }
 0x1e9   : > { %v640_v10 = vmul.f32 %v919_v0, %v639_v6  ;;  %v556_v12 = vadd.f32 %v1046_v9, %v555_v8 }
 0x1eb   : > { %v921_v13 = vpop.eup %920  ;;  %v641_v14 = vadd.f32 %v919_v0, %v640_v10  ;;  %v864_v15 = vmul.f32 -1.442695, %v556_v12 }
 0x1ec   : > { %v923_v16 = vpop.eup %922  ;;  %v589_v18 = vadd.f32 1.0, %v921_v13 }
 0x1ed   : > { %v645_v19 = vsel %vm644_vm1, %v919_v0, %v641_v14  ;;  %v653_v20 = vmul.f32 %v923_v16, %v588_v2  ;;  %924 = vpow2.f32 %v864_v15  ;;  %vm658_vm3 = vweird.f32 %v923_v16 }
 0x1ee   : > { %v650_v21 = vsel %vm647_vm2, %v649_v17, %v645_v19  ;;  %926 = vrcp.f32 %v589_v18  ;;  %vm659_vm6 = vmor %vm657_vm4, %vm658_vm3  ;;  %v678_v38 = vand.u32 2147483648, %v589_v18  ;;  %v676_v39 = vand.u32 2147483647, %v589_v18 }
 0x1ef   : > { %716 = vst.msk [vmem:[%s1054_s18 + $0x18] sm:$0xff] %vm712_vm5, %v650_v21  ;;  %v654_v22 = vsub.f32 1.0, %v653_v20  ;;  %vm672_vm9 = vweird.f32 %v589_v18 }
 0x1f0   : > { %v557_v24 = vpop.f32.mrf.mxu2  ;;  %v679_v43 = vor.u32 1.1754944e-38, %v678_v38  ;;  %vm677_vm11 = vcmp.eq.f32.partialorder %v676_v39, 8.507059e+37 }
 0x1f1   : > { %v655_v25 = vmul.f32 %v923_v16, %v654_v22  ;;  %v558_v27 = vadd.f32 %v1046_v9, %v557_v24 }
 0x1f3   : > { %v925_v28 = vpop.eup %924  ;;  %v656_v29 = vadd.f32 %v923_v16, %v655_v25  ;;  %v865_v30 = vmul.f32 -1.442695, %v558_v27 }
 0x1f4   : > { %v927_v31 = vpop.eup %926  ;;  %v590_v33 = vadd.f32 1.0, %v925_v28 }
 0x1f5   : > { %v660_v34 = vsel %vm659_vm6, %v923_v16, %v656_v29  ;;  %v668_v35 = vmul.f32 %v927_v31, %v589_v18  ;;  %928 = vpow2.f32 %v865_v30  ;;  %vm673_vm8 = vweird.f32 %v927_v31 }
 0x1f6   : > { %v665_v36 = vsel %vm662_vm7, %v664_v32, %v660_v34  ;;  %930 = vrcp.f32 %v590_v33  ;;  %vm674_vm10 = vmor %vm672_vm9, %vm673_vm8  ;;  %v693_v49 = vand.u32 2147483648, %v590_v33  ;;  %v691_v51 = vand.u32 2147483647, %v590_v33 }
 0x1f7   : > { %717 = vst.msk [vmem:[%s1054_s18 + $0x20] sm:$0xff] %vm712_vm5, %v665_v36  ;;  %v669_v37 = vsub.f32 1.0, %v668_v35  ;;  %vm687_vm13 = vweird.f32 %v590_v33 }
 0x1f8   : > { %v694_v54 = vor.u32 1.1754944e-38, %v693_v49  ;;  %vm692_vm15 = vcmp.eq.f32.partialorder %v691_v51, 8.507059e+37 }
 0x1f9   : > { %v670_v9 = vmul.f32 %v927_v31, %v669_v37 }
 0x1fb   : > { %v929_v40 = vpop.eup %928  ;;  %v671_v41 = vadd.f32 %v927_v31, %v670_v9 }
 0x1fc   : > { %v931_v42 = vpop.eup %930  ;;  %v591_v44 = vadd.f32 1.0, %v929_v40 }
 0x1fd   : > { %v675_v45 = vsel %vm674_vm10, %v927_v31, %v671_v41  ;;  %v683_v46 = vmul.f32 %v931_v42, %v590_v33  ;;  %vm688_vm12 = vweird.f32 %v931_v42 }
 0x1fe   : > { %v680_v47 = vsel %vm677_vm11, %v679_v43, %v675_v45  ;;  %932 = vrcp.f32 %v591_v44  ;;  %vm689_vm14 = vmor %vm687_vm13, %vm688_vm12  ;;  %v708_v59 = vand.u32 2147483648, %v591_v44  ;;  %v706_v61 = vand.u32 2147483647, %v591_v44 }
 0x1ff   : > { %718 = vst.msk [vmem:[%s1054_s18 + $0x28] sm:$0xff] %vm712_vm5, %v680_v47  ;;  %v684_v48 = vsub.f32 1.0, %v683_v46  ;;  %vm702_vm1 = vweird.f32 %v591_v44 }
 0x200   : > { %v709_v63 = vor.u32 1.1754944e-38, %v708_v59  ;;  %vm707_vm3 = vcmp.eq.f32.partialorder %v706_v61, 8.507059e+37 }
 0x201   : > { %v685_v50 = vmul.f32 %v931_v42, %v684_v48 }
 0x203   : > { %v686_v52 = vadd.f32 %v931_v42, %v685_v50 }
 0x204   : > { %v933_v53 = vpop.eup %932 }
 0x205   : > { %v690_v55 = vsel %vm689_vm14, %v931_v42, %v686_v52  ;;  %v698_v56 = vmul.f32 %v933_v53, %v591_v44  ;;  %vm703_vm0 = vweird.f32 %v933_v53 }
 0x206   : > { %v695_v57 = vsel %vm692_vm15, %v694_v54, %v690_v55  ;;  %vm704_vm2 = vmor %vm702_vm1, %vm703_vm0 }
 0x207   : > { %719 = vst.msk [vmem:[%s1054_s18 + $0x30] sm:$0xff] %vm712_vm5, %v695_v57  ;;  %v699_v58 = vsub.f32 1.0, %v698_v56 }
 0x209   : > { %v700_v60 = vmul.f32 %v933_v53, %v699_v58 }
 0x20b   : > { %v701_v62 = vadd.f32 %v933_v53, %v700_v60 }
 0x20d   : > { %v705_v0 = vsel %vm704_vm2, %v933_v53, %v701_v62 }
 0x20e   : > { %v710_v1 = vsel %vm707_vm3, %v709_v63, %v705_v0 }
 0x20f   : > { %720 = vst.msk [vmem:[%s1054_s18 + $0x38] sm:$0xff] %vm712_vm5, %v710_v1 }
 0x210 PF: > { %s17_s24 = sadd.s32 1, %s940_s24  }
 0x211   : > { %p14_p4 = scmp.ge.s32.totalorder %s17_s24, 6  }
 0x213   :  { %16 = sbr.rel (!%p14_p4) target bundleno = 1 (0x1), region = 78 }

</bundles_post_ra>
